<compile_context>
chip_gen: v5e
topology: v5e:2x2
jax: 0.10.0
libtpu: 0.0.40
codegen_flags: <defaults>
</compile_context>

<pallas_src>
import functools

import numpy as np
import jax
import jax.numpy as jnp
from jax.experimental import pallas as pl
from jax.experimental.pallas import tpu as pltpu


def _round_up(n: int, m: int) -> int:
    return (n + m - 1) // m * m


def _round_down(n: int, m: int) -> int:
    return n // m * m


def _vmem_capacity_bytes() -> int:
    try:
        return int(pltpu.get_tpu_info().vmem_capacity_bytes)
    except Exception:
        return 64 << 20  # conservative fallback (v7x per-core VMEM)


def _qubo_kernel(x_ref, q_ref, o_ref, *, n_kj: int, tkj: int):
    """out[b] += sum_{j in block} (x @ Q[:, block])[b, j] * x[b, j].

    x_ref: (tb, F_pad)   batch on sublanes, features on lanes
    q_ref: (F_pad, tkj)  current Q column block (full Q when n_kj == 1)
    o_ref: (1, tb)       lane-dense output row, resident across the kj axis
    """
    x = x_ref[...]
    q = q_ref[...]
    # MXU matmul, f32 accumulation (works for f32 or bf16 inputs).
    y = jnp.dot(x, q, preferred_element_type=jnp.float32)      # (tb, tkj)

    if n_kj == 1:
        xs = x
    else:
        kj = pl.program_id(1)
        start = pl.multiple_of(kj * tkj, tkj)
        xs = x_ref[:, pl.ds(start, tkj)]                        # (tb, tkj)

    # Elementwise multiply + lane reduce in f32 (no bf16 VPU dependence).
    partial = jnp.sum(y * xs.astype(jnp.float32), axis=1)[None, :]  # (1, tb)

    if n_kj == 1:
        o_ref[...] = partial
    else:
        kj = pl.program_id(1)

        @pl.when(kj == 0)
        def _init():
            o_ref[...] = partial

        @pl.when(kj != 0)
        def _accumulate():
            o_ref[...] = o_ref[...] + partial


def molecule_model_forward(x: jax.Array, Q: jax.Array, *,
                           use_bf16_matmul: bool = False,
                           max_q_block_bytes: int | None = None) -> jax.Array:
    """Pallas implementation of MoleculeModel.forward.

    x: (B, F) float feature batch, Q: (F, F) masked parameter matrix.
    Returns (B, 1) float32 predictions, out[b] = x[b] @ Q @ x[b].
    """
    B, F = x.shape
    assert Q.shape == (F, F)

    dt = jnp.bfloat16 if use_bf16_matmul else jnp.float32
    item = 2 if use_bf16_matmul else 4
    x = x.astype(dt)
    Q = Q.astype(dt)

    cap = _vmem_capacity_bytes()
    budget = int(cap * 0.6)  # headroom for Mosaic internals / pipeline bufs
    q_budget = max_q_block_bytes if max_q_block_bytes is not None else budget // 2

    # ---- Q blocking: resident Q when it fits, streamed column blocks otherwise.
    q_bytes = F * F * item
    if q_bytes <= q_budget:
        n_kj, tkj, F_pad = 1, F, F
        # Resident Q: single-buffer it when it is large enough to matter
        # (constant index_map => never re-fetched, double-buffering is waste).
        if q_bytes >= (2 << 20):
            q_pipeline_mode = pl.Buffered(1)
            q_buf_bytes = q_bytes
        else:
            q_pipeline_mode = None
            q_buf_bytes = 2 * q_bytes
    else:
        F_pad0 = _round_up(F, 128)
        tkj = max(128, _round_down(q_budget // (2 * F_pad0 * item), 128))
        F_pad = _round_up(F, tkj)
        n_kj = F_pad // tkj
        q_pipeline_mode = None
        q_buf_bytes = 2 * F_pad * tkj * item  # streamed, double-buffered
    tkj_eff = tkj if n_kj > 1 else F_pad

    # ---- Batch tile: target ~4 MiB x tiles, clamped by VMEM budget and B,
    #      and capped near B/2 so the parallel axis can split across cores.
    per_row_bytes = 2 * F_pad * item + 8 + 8 * tkj_eff  # x dbuf + out dbuf + f32 temps
    tb_budget = max(128, _round_down(max(budget - q_buf_bytes, 0) // per_row_bytes, 128))
    tb_target = max(128, _round_down((4 << 20) // max(F_pad * item, 1), 128))
    tb = min(tb_budget, tb_target)

    B128 = _round_up(B, 128)
    tb = min(tb, B128)
    if B128 >= 256:
        tb = min(tb, max(128, _round_down(B128 // 2, 128)))
    B_pad = _round_up(B, tb)
    n_tiles = B_pad // tb

    # ---- Zero padding (batch rows and feature columns contribute zero).
    if (B_pad, F_pad) != (B, F):
        x = jnp.pad(x, ((0, B_pad - B), (0, F_pad - F)))
    if F_pad != F:
        Q = jnp.pad(Q, ((0, F_pad - F), (0, F_pad - F)))

    # ---- Generation-aware VMEM limit from the real tile footprint.
    footprint = (2 * tb * F_pad * item          # x tiles (double-buffered)
                 + q_buf_bytes                  # Q (resident or streamed blocks)
                 + 2 * tb * 4                   # output tiles
                 + 2 * tb * tkj_eff * 4)        # f32 y + f32 cast temporaries
    vmem_limit = int(min(max(footprint + (4 << 20), 16 << 20), cap - (2 << 20)))

    q_spec_kwargs = {}
    if q_pipeline_mode is not None:
        q_spec_kwargs["pipeline_mode"] = q_pipeline_mode

    out = pl.pallas_call(
        functools.partial(_qubo_kernel, n_kj=n_kj, tkj=tkj_eff),
        out_shape=jax.ShapeDtypeStruct((1, B_pad), jnp.float32),
        grid_spec=pltpu.PrefetchScalarGridSpec(
            num_scalar_prefetch=0,
            grid=(n_tiles, n_kj),
            in_specs=[
                pl.BlockSpec((tb, F_pad), lambda i, kj: (i, 0)),          # x tile
                pl.BlockSpec((F_pad, tkj_eff), lambda i, kj: (0, kj),     # Q block
                             **q_spec_kwargs),
            ],
            out_specs=pl.BlockSpec((1, tb), lambda i, kj: (0, i)),        # lane-dense
        ),
        compiler_params=pltpu.CompilerParams(
            dimension_semantics=("parallel", "arbitrary"),
            vmem_limit_bytes=vmem_limit,
        ),
        cost_estimate=pl.CostEstimate(
            flops=2 * B_pad * F_pad * F_pad + 2 * B_pad * F_pad,
            transcendentals=0,
            bytes_accessed=(B_pad * F_pad * item
                            + F_pad * F_pad * item * (n_tiles if n_kj > 1 else 1)
                            + B_pad * 4),
        ),
    )(x, Q)

    # Drop padded samples and restore the PyTorch (B, 1) view.
    return out[0, :B].reshape(B, 1)


def make_masked_Q(key, num_features: int,
                  elements_to_ignore_interaction_between=None,
                  elements_to_ignore_internal_interaction=None) -> jax.Array:
    """Build Q the way MoleculeModel.__init__ does: xavier_normal init
    (std = sqrt(2 / (fan_in + fan_out))), then zero all masked entries
    (strict lower triangle + ignore ranges; diagonal always kept)."""
    F = num_features
    std = float(np.sqrt(2.0 / (F + F)))
    Q = std * jax.random.normal(key, (F, F), dtype=jnp.float32)

    mask = np.tril(np.ones((F, F), dtype=bool), k=-1)  # True = zero out
    if elements_to_ignore_interaction_between is not None:
        for (r1s, r1e), (r2s, r2e) in elements_to_ignore_interaction_between:
            mask[r1s - 1:r1e, r2s - 1:r2e] = True
            mask[r2s - 1:r2e, r1s - 1:r1e] = True
    if elements_to_ignore_internal_interaction is not None:
        for start, end in elements_to_ignore_internal_interaction:
            mask[start - 1:end, :] = True
            mask[:, start - 1:end] = True
    mask[np.eye(F, dtype=bool)] = False  # diagonal always kept (as in PyTorch)

    return jnp.where(jnp.asarray(mask), 0.0, Q)


if __name__ == "__main__":
    key = jax.random.PRNGKey(0)
    kq, kx, kq2, kx2 = jax.random.split(key, 4)

    # --- small shape consistent with the module (resident-Q, single kj step)
    num_features, batch = 32, 8
    Q = make_masked_Q(kq, num_features)
    x = jax.random.normal(kx, (batch, num_features), dtype=jnp.float32)

    out = jax.block_until_ready(molecule_model_forward(x, Q))
    ref = jnp.diag(x @ Q @ x.T).reshape(-1, 1)
    np.testing.assert_allclose(np.asarray(out), np.asarray(ref),
                               rtol=1e-5, atol=1e-5)
    assert out.shape == (batch, 1)

    # --- exercise the Q-column-blocked (streamed) path + batch padding by
    #     forcing a tiny resident-Q budget.
    F2, B2 = 256, 200
    Q2 = make_masked_Q(kq2, F2)
    x2 = jax.random.normal(kx2, (B2, F2), dtype=jnp.float32)
    out2 = jax.block_until_ready(
        molecule_model_forward(x2, Q2, max_q_block_bytes=200 * 1024))
    ref2 = jnp.diag(x2 @ Q2 @ x2.T).reshape(-1, 1)
    np.testing.assert_allclose(np.asarray(out2), np.asarray(ref2),
                               rtol=1e-4, atol=1e-4)

    # --- bf16 MXU fast path (opt-in, f32 accumulation, looser tolerance).
    out_bf16 = jax.block_until_ready(
        molecule_model_forward(x, Q, use_bf16_matmul=True))
    np.testing.assert_allclose(np.asarray(out_bf16), np.asarray(ref),
                               rtol=1e-1, atol=1e-1)

    print("KERNEL_OK")
</pallas_src>

<mosaic_0001>
module attributes {stable_mosaic.version = 11 : i64} {
  func.func @_qubo_kernel(%arg0: i32, %arg1: i32, %arg2: memref<128x32xf32, #tpu.memory_space<vmem>>, %arg3: memref<32x32xf32, #tpu.memory_space<vmem>>, %arg4: memref<1x128xf32, #tpu.memory_space<vmem>>) attributes {dimension_semantics = [#tpu.dimension_semantics<parallel>, #tpu.dimension_semantics<arbitrary>], iteration_bounds = array<i64: 1, 1>, scalar_prefetch = 0 : i64, scratch_operands = 0 : i64, tpu.core_type = #tpu.core_type<tc>, window_params = [{transform_indices = @transform_0, window_bounds = array<i64: 128, 32>}, {transform_indices = @transform_1, window_bounds = array<i64: 32, 32>}, {transform_indices = @transform_2, window_bounds = array<i64: 1, 128>}]} {
    %c0 = arith.constant 0 : index
    %c0_0 = arith.constant 0 : index
    %0 = vector.load %arg2[%c0, %c0_0] : memref<128x32xf32, #tpu.memory_space<vmem>>, vector<128x32xf32>
    %c0_1 = arith.constant 0 : index
    %c0_2 = arith.constant 0 : index
    %1 = vector.load %arg3[%c0_1, %c0_2] : memref<32x32xf32, #tpu.memory_space<vmem>>, vector<32x32xf32>
    %cst = arith.constant dense<0.000000e+00> : vector<128x32xf32>
    %2 = tpu.matmul %0, %1, %cst {dimension_numbers = #tpu.dot_dimension_numbers<[1], [0], [0], [1], [0, 0, 1, 1], [], []>} : vector<128x32xf32>, vector<32x32xf32>, vector<128x32xf32> -> vector<128x32xf32>
    %3 = arith.mulf %2, %0 : vector<128x32xf32>
    %cst_3 = arith.constant dense<0.000000e+00> : vector<128xf32>
    %4 = vector.multi_reduction <add>, %3, %cst_3 [1] : vector<128x32xf32> to vector<128xf32>
    %5 = vector.shape_cast %4 : vector<128xf32> to vector<1x128xf32>
    %c0_4 = arith.constant 0 : index
    %c0_5 = arith.constant 0 : index
    %6 = vector.load %arg4[%c0_4, %c0_5] : memref<1x128xf32, #tpu.memory_space<vmem>>, vector<1x128xf32>
    tpu.vector_store %arg4[%c0_4, %c0_5], %5 {strides = array<i32>} : memref<1x128xf32, #tpu.memory_space<vmem>>, vector<1x128xf32>,
    return
  }
  func.func @transform_0(%arg0: i32, %arg1: i32) -> (i32, i32) {
    %c0_i32 = arith.constant 0 : i32
    %c0_i32_0 = arith.constant 0 : i32
    return %arg0, %c0_i32 : i32, i32
  }
  func.func @transform_1(%arg0: i32, %arg1: i32) -> (i32, i32) {
    %c0_i32 = arith.constant 0 : i32
    %c0_i32_0 = arith.constant 0 : i32
    return %c0_i32, %arg1 : i32, i32
  }
  func.func @transform_2(%arg0: i32, %arg1: i32) -> (i32, i32) {
    %c0_i32 = arith.constant 0 : i32
    %c0_i32_0 = arith.constant 0 : i32
    return %c0_i32, %arg0 : i32, i32
  }
}

</mosaic_0001>

<bundles_post_ra>
// kernel: tpu_custom_call.1
= control target key start
LH: loop header
LB: loop body
LE: loop exit
PB: predicated region body
PF: predicated region fallthrough
CT: control target
= control target key end

     0   :  { %vm32_vm0 = vcmask 261120   ;;  %s485_s0 = inlined_call_operand.vmem [shape: f32[128,32], index: 0, kind: input, shape index: {}]   ;;  %s486_s1 = inlined_call_operand.vmem [shape: f32[32,32], index: 1, kind: input, shape index: {}]   ;;  %s487_s2 = inlined_call_operand.hbm [shape: f32[1,128], index: 2, kind: output, shape index: {}]  }
   0x1   :  { %v31_v0 = vld [vmem:[%s486_s1 + $0x18] sm:$0xff]  ;;  %v30_v1 = vld [vmem:[%s486_s1 + $0x10] sm:$0xff]  ;;  %v29_v2 = vld [vmem:[%s486_s1 + $0x8] sm:$0xff] }
   0x2   :  { %93 = vmatpush.msra.mxu0 %v31_v0  ;;  %323 = vmatpush.msra.mxu1 %v31_v0  ;;  %v28_v3 = vld [vmem:[%s486_s1] sm:$0xff] }
   0x3   :  { %324 = vmatpush.msra.mxu2 %v31_v0  ;;  %325 = vmatpush.msra.mxu3 %v31_v0  ;;  %v12_v4 = vld [vmem:[%s485_s0] sm:$0xff] }
   0x4   :  { %94 = vmatpush.msra.mxu0 %v30_v1  ;;  %326 = vmatpush.msra.mxu1 %v30_v1  ;;  %v16_v5 = vld [vmem:[%s485_s0 + $0x20] sm:$0xff] }
   0x5   :  { %327 = vmatpush.msra.mxu2 %v30_v1  ;;  %328 = vmatpush.msra.mxu3 %v30_v1 }
   0x6   :  { %95 = vmatpush.msra.mxu0 %v29_v2  ;;  %329 = vmatpush.msra.mxu1 %v29_v2 }
   0x7   :  { %330 = vmatpush.msra.mxu2 %v29_v2  ;;  %331 = vmatpush.msra.mxu3 %v29_v2 }
   0x8   :  { %7 = vsyncpa [#allocation3], 0  ;;  %96 = vmatpush.msra.mxu0 %v28_v3  ;;  %332 = vmatpush.msra.mxu1 %v28_v3  ;;  %v20_v6 = vld [vmem:[%s485_s0 + $0x40] sm:$0xff]  ;;  %v13_v8 = vld [vmem:[%s485_s0 + $0x8] sm:$0xff]  ;;  %vm231_vm1 = vcmask 130112   ;;  %vm235_vm2 = vcmask 195712  }
   0x9   :  { %v402_v7 = vld [vmem:[%s485_s0 + $0x60] sm:$0xff]  ;;  %307 = vmatmul.msk.f32.vlgmr.msra.gmra.mxu0 %vm32_vm0, %v12_v4  ;;  %311 = vmatmul.msk.f32.vlgmr.msra.gmra.mxu1 %vm32_vm0, %v16_v5  ;;  %v17_v9 = vld [vmem:[%s485_s0 + $0x28] sm:$0xff]  ;;  %v14_v12 = vld [vmem:[%s485_s0 + $0x10] sm:$0xff]  ;;  %vm239_vm3 = vcmask 261312   ;;  %vm243_vm4 = vcmask 326912   ;;  %vm247_vm5 = vcmask 392512  }
   0xa   :  { %333 = vmatpush.msra.mxu2 %v28_v3  ;;  %334 = vmatpush.msra.mxu3 %v28_v3  ;;  %v21_v10 = vld [vmem:[%s485_s0 + $0x48] sm:$0xff]  ;;  %v18_v13 = vld [vmem:[%s485_s0 + $0x30] sm:$0xff]  ;;  %v15_v16 = vld [vmem:[%s485_s0 + $0x18] sm:$0xff]  ;;  %vm251_vm6 = vcmask 458112   ;;  %vm255_vm7 = vcmask 523712   ;;  %vm259_vm8 = vcmask 589312  }
   0xb   :  { %315 = vmatmul.msk.f32.vlgmr.msra.gmra.mxu2 %vm32_vm0, %v20_v6  ;;  %319 = vmatmul.msk.f32.vlgmr.msra.gmra.mxu3 %vm32_vm0, %v402_v7  ;;  %v421_v11 = vld [vmem:[%s485_s0 + $0x68] sm:$0xff]  ;;  %v22_v14 = vld [vmem:[%s485_s0 + $0x50] sm:$0xff]  ;;  %v19_v17 = vld [vmem:[%s485_s0 + $0x38] sm:$0xff]  ;;  %vm263_vm9 = vcmask 654912   ;;  %vm267_vm10 = vcmask 720512   ;;  %vm271_vm11 = vcmask 786112  }
   0xc   :  { %v440_v15 = vld [vmem:[%s485_s0 + $0x70] sm:$0xff]  ;;  %v23_v18 = vld [vmem:[%s485_s0 + $0x58] sm:$0xff]  ;;  %vm275_vm12 = vcmask 851712   ;;  %vm279_vm13 = vcmask 917312   ;;  %vm283_vm14 = vcmask 982912   ;;  %s298_s1 = sshll.u32 %s487_s2, 4  ;;  %s299_s1 = int_to_ptr.hbm [resolvable:$true] %s298_s1 }
   0xd   :  { %v27_v19 = vld [vmem:[%s485_s0 + $0x78] sm:$0xff]  ;;  %s362_s0 = smov [#allocation2]   ;;  %vm287_vm15 = vcmask 1048512  }
   0xe   :  { %s296_s20 = sshll.u32 %s362_s0, 4  ;;  %s297_s20 = int_to_ptr.vmem [resolvable:$true] %s296_s20 }
  0x11   :  { %308 = vmatmul.msk.f32.gmra.mxu0 %vm32_vm0, %v13_v8  ;;  %312 = vmatmul.msk.f32.gmra.mxu1 %vm32_vm0, %v17_v9 }
  0x13   :  { %316 = vmatmul.msk.f32.gmra.mxu2 %vm32_vm0, %v21_v10  ;;  %320 = vmatmul.msk.f32.gmra.mxu3 %vm32_vm0, %v421_v11 }
  0x19   :  { %309 = vmatmul.msk.f32.gmra.mxu0 %vm32_vm0, %v14_v12  ;;  %313 = vmatmul.msk.f32.gmra.mxu1 %vm32_vm0, %v18_v13 }
  0x1b   :  { %317 = vmatmul.msk.f32.gmra.mxu2 %vm32_vm0, %v22_v14  ;;  %321 = vmatmul.msk.f32.gmra.mxu3 %vm32_vm0, %v440_v15 }
  0x21   :  { %310 = vmatmul.msk.f32.gmra.mxu0 %vm32_vm0, %v15_v16  ;;  %314 = vmatmul.msk.f32.gmra.mxu1 %vm32_vm0, %v19_v17 }
  0x23   :  { %318 = vmatmul.msk.f32.gmra.mxu2 %vm32_vm0, %v23_v18  ;;  %322 = vmatmul.msk.f32.gmra.mxu3 %vm32_vm0, %v27_v19 }
  0x86   :  { %v98_v20 = vpop.f32.mrf.mxu0  ;;  %v110_v21 = vpop.f32.mrf.mxu1 }
  0x87   :  { %v146_v22 = vmul.f32 %v98_v20, %v12_v4  ;;  %v150_v23 = vmul.f32 %v110_v21, %v16_v5 }
  0x89   :  { %v174_v24 = vsel %vm32_vm0, %v150_v23, 0.0  ;;  %v162_v25 = vsel %vm32_vm0, %v146_v22, 0.0 }
  0x8a   :  { %175 = vadd.xlane.f32.xlu2 %v174_v24  ;;  %163 = vadd.xlane.f32.xlu0 %v162_v25 }
  0x8e   :  { %v101_v26 = vpop.f32.mrf.mxu0  ;;  %v122_v27 = vpop.f32.mrf.mxu2 }
  0x8f   :  { %v147_v28 = vmul.f32 %v101_v26, %v13_v8  ;;  %v154_v29 = vmul.f32 %v122_v27, %v20_v6  ;;  %v113_v30 = vpop.f32.mrf.mxu1  ;;  %v134_v31 = vpop.f32.mrf.mxu3 }
  0x90   :  { %v151_v34 = vmul.f32 %v113_v30, %v17_v9  ;;  %v158_v52 = vmul.f32 %v134_v31, %v402_v7  ;;  %v226_v9 = vlaneseq }
  0x91   :  { %v186_v32 = vsel %vm32_vm0, %v154_v29, 0.0  ;;  %v165_v33 = vsel %vm32_vm0, %v147_v28, 0.0 }
  0x92   :  { %187 = vadd.xlane.f32.xlu2 %v186_v32  ;;  %166 = vadd.xlane.f32.xlu0 %v165_v33  ;;  %v177_v41 = vsel %vm32_vm0, %v151_v34, 0.0  ;;  %v198_v58 = vsel %vm32_vm0, %v158_v52, 0.0 }
  0x96   :  { %v104_v35 = vpop.f32.mrf.mxu0  ;;  %v125_v36 = vpop.f32.mrf.mxu2 }
  0x97   :  { %v148_v37 = vmul.f32 %v104_v35, %v14_v12  ;;  %v155_v38 = vmul.f32 %v125_v36, %v21_v10  ;;  %v137_v39 = vpop.f32.mrf.mxu3  ;;  %v116_v40 = vpop.f32.mrf.mxu1  ;;  %v227_v12 = vand.u32 127, %v226_v9 }
  0x98   :  { %v152_v44 = vmul.f32 %v116_v40, %v18_v13  ;;  %v159_v2 = vmul.f32 %v137_v39, %v421_v11 }
  0x99   :  { %v189_v42 = vsel %vm32_vm0, %v155_v38, 0.0  ;;  %v168_v43 = vsel %vm32_vm0, %v148_v37, 0.0  ;;  %v241_v20 = vadd.s32 4294967264, %v227_v12  ;;  %v245_v24 = vadd.s32 4294967256, %v227_v12 }
  0x9a   :  { %190 = vadd.xlane.f32.xlu0 %v189_v42  ;;  %169 = vadd.xlane.f32.xlu1 %v168_v43  ;;  %v180_v47 = vsel %vm32_vm0, %v152_v44, 0.0  ;;  %v201_v3 = vsel %vm32_vm0, %v159_v2, 0.0  ;;  %v249_v29 = vadd.s32 4294967248, %v227_v12  ;;  %v253_v33 = vadd.s32 4294967240, %v227_v12 }
  0x9b   :  { %178 = vadd.xlane.f32.xlu2 %v177_v41  ;;  %v257_v34 = vadd.s32 4294967232, %v227_v12  ;;  %v261_v36 = vadd.s32 4294967224, %v227_v12  ;;  %v265_v39 = vadd.s32 4294967216, %v227_v12  ;;  %v269_v41 = vadd.s32 4294967208, %v227_v12 }
  0x9c   :  { %v277_v52 = vadd.s32 4294967192, %v227_v12 }
  0x9e   :  { %v128_v45 = vpop.f32.mrf.mxu2  ;;  %v107_v49 = vpop.f32.mrf.mxu0 }
  0x9f   :  { %v156_v46 = vmul.f32 %v128_v45, %v22_v14  ;;  %v140_v48 = vpop.f32.mrf.mxu3  ;;  %v149_v51 = vmul.f32 %v107_v49, %v15_v16  ;;  %v119_v56 = vpop.f32.mrf.mxu1  ;;  %v229_v14 = vadd.s32 4294967288, %v227_v12 }
  0xa0   :  { %v153_v60 = vmul.f32 %v119_v56, %v19_v17  ;;  %v160_v62 = vmul.f32 %v140_v48, %v440_v15  ;;  %v233_v15 = vadd.s32 4294967280, %v227_v12  ;;  %v273_v48 = vadd.s32 4294967200, %v227_v12 }
  0xa1   :  { %v192_v50 = vsel %vm32_vm0, %v156_v46, 0.0  ;;  %v171_v55 = vsel %vm32_vm0, %v149_v51, 0.0 }
  0xa2   :  { %181 = vadd.xlane.f32.xlu0 %v180_v47  ;;  %193 = vadd.xlane.f32.xlu1 %v192_v50  ;;  %v183_v63 = vsel %vm32_vm0, %v153_v60, 0.0  ;;  %v204_v1 = vsel %vm32_vm0, %v160_v62, 0.0 }
  0xa6   :  { %v131_v53 = vpop.f32.mrf.mxu2 }
  0xa7   :  { %v157_v54 = vmul.f32 %v131_v53, %v23_v18  ;;  %v143_v57 = vpop.f32.mrf.mxu3  ;;  %v285_v53 = vadd.s32 4294967176, %v227_v12 }
  0xa8   :  { %v161_v61 = vmul.f32 %v143_v57, %v27_v19  ;;  %v237_v19 = vadd.s32 4294967272, %v227_v12 }
  0xa9   :  { %v195_v59 = vsel %vm32_vm0, %v157_v54, 0.0  ;;  %v281_v54 = vadd.s32 4294967184, %v227_v12 }
  0xaa   :  { %199 = vadd.xlane.f32.xlu0 %v198_v58  ;;  %172 = vadd.xlane.f32.xlu1 %v171_v55  ;;  %v207_v0 = vsel %vm32_vm0, %v161_v61, 0.0 }
  0xab   :  { %196 = vadd.xlane.f32.xlu2 %v195_v59 }
  0xb2   :  { %184 = vadd.xlane.f32.xlu1 %v183_v63  ;;  %208 = vadd.xlane.f32.xlu0 %v207_v0 }
  0xb3   :  { %205 = vadd.xlane.f32.xlu2 %v204_v1 }
  0xba   :  { %202 = vadd.xlane.f32.xlu1 %v201_v3 }
  0xfd   :  { %v164_v4 = vpop.xlane.xlu0 %163  ;;  %v176_v6 = vpop.xlane.xlu2 %175 }
  0xfe   :  { %v228_v21 = vperm.slane %v164_v4, %v227_v12  ;;  %v242_v26 = vperm.slane %v176_v6, %v241_v20 }
 0x105   :  { %v167_v5 = vpop.xlane.xlu0 %166  ;;  %v188_v10 = vpop.xlane.xlu2 %187 }
 0x106   :  { %v230_v17 = vperm.slane %v167_v5, %v229_v14  ;;  %v258_v43 = vperm.slane %v188_v10, %v257_v34 }
 0x108   :  { %v232_v23 = vsel %vm231_vm1, %v230_v17, %v228_v21 }
 0x10d   :  { %v170_v7 = vpop.xlane.xlu1 %169  ;;  %v191_v8 = vpop.xlane.xlu0 %190 }
 0x10e   :  { %v179_v18 = vpop.xlane.xlu2 %178  ;;  %v234_v11 = vperm.slane %v170_v7, %v233_v15  ;;  %v262_v45 = vperm.slane %v191_v8, %v261_v36 }
 0x10f   :  { %v246_v31 = vperm.slane %v179_v18, %v245_v24 }
 0x110   :  { %v236_v27 = vsel %vm235_vm2, %v234_v11, %v232_v23 }
 0x115   :  { %v194_v13 = vpop.xlane.xlu1 %193  ;;  %v182_v16 = vpop.xlane.xlu0 %181 }
 0x116   :  { %v250_v38 = vperm.slane %v182_v16, %v249_v29  ;;  %v266_v47 = vperm.slane %v194_v13, %v265_v39 }
 0x11d   :  { %v173_v22 = vpop.xlane.xlu1 %172  ;;  %v200_v35 = vpop.xlane.xlu0 %199 }
 0x11e   :  { %v238_v25 = vperm.slane %v173_v22, %v237_v19  ;;  %v197_v32 = vpop.xlane.xlu2 %196  ;;  %v274_v59 = vperm.slane %v200_v35, %v273_v48 }
 0x11f   :  { %v270_v50 = vperm.slane %v197_v32, %v269_v41 }
 0x120   :  { %v240_v28 = vsel %vm239_vm3, %v238_v25, %v236_v27 }
 0x121   :  { %v244_v30 = vsel %vm243_vm4, %v242_v26, %v240_v28 }
 0x122   :  { %v248_v37 = vsel %vm247_vm5, %v246_v31, %v244_v30 }
 0x123   :  { %v252_v44 = vsel %vm251_vm6, %v250_v38, %v248_v37 }
 0x125   :  { %v185_v40 = vpop.xlane.xlu1 %184  ;;  %v209_v56 = vpop.xlane.xlu0 %208 }
 0x126   :  { %v254_v42 = vperm.slane %v185_v40, %v253_v33  ;;  %v206_v57 = vpop.xlane.xlu2 %205  ;;  %v286_v62 = vperm.slane %v209_v56, %v285_v53 }
 0x127   :  { %v282_v63 = vperm.slane %v206_v57, %v281_v54 }
 0x128   :  { %v256_v46 = vsel %vm255_vm7, %v254_v42, %v252_v44 }
 0x129   :  { %v260_v49 = vsel %vm259_vm8, %v258_v43, %v256_v46 }
 0x12a   :  { %v264_v51 = vsel %vm263_vm9, %v262_v45, %v260_v49 }
 0x12b   :  { %v268_v55 = vsel %vm267_vm10, %v266_v47, %v264_v51 }
 0x12c   :  { %v272_v58 = vsel %vm271_vm11, %v270_v50, %v268_v55 }
 0x12d   :  { %v203_v60 = vpop.xlane.xlu1 %202  ;;  %v276_v0 = vsel %vm275_vm12, %v274_v59, %v272_v58 }
 0x12e   :  { %v278_v61 = vperm.slane %v203_v60, %v277_v52 }
 0x130   :  { %v280_v1 = vsel %vm279_vm13, %v278_v61, %v276_v0 }
 0x131   :  { %v284_v2 = vsel %vm283_vm14, %v282_v63, %v280_v1 }
 0x132   :  { %v288_v3 = vsel %vm287_vm15, %v286_v62, %v284_v2 }
 0x133   :  { %290 = vst [vmem:[#allocation2] sm:$0x1] %v288_v3 }
 0x134   :  { %301 = dma.vmem_to_hbm [thread:$0]  %s297_s20, 16, %s299_s1, [#allocation3]  }
 0x135   :  { %360 = dma.done.wait [#allocation3], 16  }
 0x136   :  { %361 = vsyncadd [#allocation3], 4294967280 }
 0x137   :  { %306 = vsyncpa [#allocation3], 1 }

</bundles_post_ra>
